<compile_context>
chip_gen: v7x
topology: tpu7x:2x2x1
jax: 0.10.0
libtpu: 0.0.40
codegen_flags: <defaults>
</compile_context>

<pallas_src>
import functools

import jax
import jax.numpy as jnp
from jax.experimental import pallas as pl
from jax.experimental.pallas import tpu as pltpu

TILE_N = 1024            # batch tile for the (rare) large-batch grid path
SMALL_BATCH_MAX = 8192   # up to this many rows: gridless single-VMEM-tile path


def mlp_kernel(x_ref, w1_ref, b1_ref, w2_ref, b2_ref, o_ref):
    """Fused Linear -> ReLU -> Linear -> log_softmax (over last axis).

    The class axis is kept at its logical width (num_classes).  The final
    store is a tiny masked vst, which is negligible versus eliminating the
    padded 128-lane output writeback and the wrapper slice copy.
    """
    x = x_ref[...].astype(jnp.float32)                            # [TN, D_in]

    # Hidden layer: x @ W1 + b1, ReLU (MXU matmul + VPU elementwise).
    h = jnp.dot(x, w1_ref[...], preferred_element_type=jnp.float32)
    h = jnp.maximum(h + b1_ref[...], 0.0)                         # [TN, H]

    # Output layer at logical class width.
    logits = jnp.dot(h, w2_ref[...], preferred_element_type=jnp.float32)
    logits = logits + b2_ref[...]                                 # [TN, C]

    # Numerically stable log_softmax over the class lanes (exp/log on EUP).
    m = jnp.max(logits, axis=1, keepdims=True)                    # [TN, 1]
    shifted = logits - m
    sum_exp = jnp.sum(jnp.exp(shifted), axis=1, keepdims=True)    # [TN, 1]
    o_ref[...] = (shifted - jnp.log(sum_exp)).astype(o_ref.dtype)


def prepare_params(w1, b1, w2, b2):
    """One-time parameter prep (call ONCE, outside the per-forward path).

    Converts PyTorch-layout nn.Linear params to kernel-ready f32 tensors:
      w1 [H, D_in] -> [D_in, H]
      b1 [H]       -> [1, H]
      w2 [C, H]    -> [H, C]
      b2 [C]       -> [1, C]
    """
    h_dim = w1.shape[0]
    c_dim = w2.shape[0]
    w1_t = jnp.asarray(w1, jnp.float32).T
    b1_r = jnp.asarray(b1, jnp.float32).reshape(1, h_dim)
    w2_t = jnp.asarray(w2, jnp.float32).T
    b2_r = jnp.asarray(b2, jnp.float32).reshape(1, c_dim)
    return w1_t, b1_r, w2_t, b2_r


def _forward_single_tile(x, w1_t, b1_r, w2_t, b2_r):
    """Whole batch in one VMEM tile: gridless call, no pipelining machinery."""
    n = x.shape[0]
    c_dim = w2_t.shape[1]
    return pl.pallas_call(
        mlp_kernel,
        out_shape=jax.ShapeDtypeStruct((n, c_dim), jnp.float32),
    )(x, w1_t, b1_r, w2_t, b2_r)


def _forward_tiled(x, w1_t, b1_r, w2_t, b2_r, *, tile_n=TILE_N):
    """Batch-tiled path: grid over N ("parallel" for megacore / v7x 2 TCs).

    No pad / no slice epilogues: Pallas masks the partial last block; rows are
    independent so garbage OOB reads of the x tail are harmless and OOB output
    writes are dropped.  Weights stay VMEM-resident via constant index maps.
    """
    n, d_in = x.shape
    h_dim = w1_t.shape[1]
    c_dim = w2_t.shape[1]
    return pl.pallas_call(
        mlp_kernel,
        out_shape=jax.ShapeDtypeStruct((n, c_dim), jnp.float32),
        grid=(pl.cdiv(n, tile_n),),
        in_specs=[
            pl.BlockSpec((tile_n, d_in), lambda i: (i, 0)),
            pl.BlockSpec((d_in, h_dim), lambda i: (0, 0)),
            pl.BlockSpec((1, h_dim), lambda i: (0, 0)),
            pl.BlockSpec((h_dim, c_dim), lambda i: (0, 0)),
            pl.BlockSpec((1, c_dim), lambda i: (0, 0)),
        ],
        out_specs=pl.BlockSpec((tile_n, c_dim), lambda i: (i, 0)),
        compiler_params=pltpu.CompilerParams(
            dimension_semantics=("parallel",)),
    )(x, w1_t, b1_r, w2_t, b2_r)


@jax.jit
def net_forward(x, w1_t, b1_r, w2_t, b2_r):
    """Forward pass. `x` is [N, D_in] (any float dtype); params from prepare_params."""
    if x.shape[0] <= SMALL_BATCH_MAX:
        return _forward_single_tile(x, w1_t, b1_r, w2_t, b2_r)
    return _forward_tiled(x, w1_t, b1_r, w2_t, b2_r)


def _torch_linear_init(key, fan_out, fan_in):
    """Deterministic init matching nn.Linear.reset_parameters ranges:
    U(-1/sqrt(fan_in), 1/sqrt(fan_in)) for both weight and bias."""
    kw, kb = jax.random.split(key)
    bound = 1.0 / jnp.sqrt(jnp.float32(fan_in))
    w = jax.random.uniform(kw, (fan_out, fan_in), jnp.float32, -bound, bound)
    b = jax.random.uniform(kb, (fan_out,), jnp.float32, -bound, bound)
    return w, b


def reference_forward(x, w1, b1, w2, b2):
    """Pure-JAX reference (PyTorch-layout weights) for correctness checks."""
    h = jnp.maximum(x.astype(jnp.float32) @ w1.T + b1, 0.0)
    logits = h @ w2.T + b2
    return jax.nn.log_softmax(logits, axis=1)


if __name__ == "__main__":
    # Net(structure=[10, 10], num_classes=2): Linear(10,10) -> ReLU -> Linear(10,2)
    D_IN, HIDDEN, NUM_CLASSES = 10, 10, 2

    key = jax.random.PRNGKey(0)
    kx1, kx2, k1, k2 = jax.random.split(key, 4)

    w1, b1 = _torch_linear_init(k1, HIDDEN, D_IN)          # fc[0]
    w2, b2 = _torch_linear_init(k2, NUM_CLASSES, HIDDEN)   # final

    # One-time parameter prep, hoisted out of the per-call forward path.
    params = prepare_params(w1, b1, w2, b2)

    # Small batch (module default batch_size=32): gridless single-tile path.
    x_small = jax.random.normal(kx1, (32, D_IN), jnp.float32)
    out_small = jax.block_until_ready(net_forward(x_small, *params))
    ref_small = reference_forward(x_small, w1, b1, w2, b2)
    assert out_small.shape == (32, NUM_CLASSES)
    assert jnp.allclose(out_small, ref_small, atol=1e-5, rtol=1e-5), \
        "small-batch mismatch"

    # Validate the tiled grid path at small shapes (3 blocks, partial last
    # block of 72 rows — exercises the no-pad / no-slice partial-block logic).
    x_tiled = jax.random.normal(kx2, (328, D_IN), jnp.float32)
    tiled_fn = jax.jit(functools.partial(_forward_tiled, tile_n=128))
    out_tiled = jax.block_until_ready(tiled_fn(x_tiled, *params))
    ref_tiled = reference_forward(x_tiled, w1, b1, w2, b2)
    assert out_tiled.shape == (328, NUM_CLASSES)
    assert jnp.allclose(out_tiled, ref_tiled, atol=1e-5, rtol=1e-5), \
        "tiled-batch mismatch"

    print("KERNEL_OK")
</pallas_src>

<mosaic_0001>
module attributes {stable_mosaic.version = 11 : i64} {
  func.func @mlp_kernel(%arg0: memref<32x10xf32, #tpu.memory_space<vmem>>, %arg1: memref<10x10xf32, #tpu.memory_space<vmem>>, %arg2: memref<1x10xf32, #tpu.memory_space<vmem>>, %arg3: memref<10x2xf32, #tpu.memory_space<vmem>>, %arg4: memref<1x2xf32, #tpu.memory_space<vmem>>, %arg5: memref<32x2xf32, #tpu.memory_space<vmem>>) attributes {dimension_semantics = [], scalar_prefetch = 0 : i64, scratch_operands = 0 : i64, tpu.core_type = #tpu.core_type<tc>} {
    %c0 = arith.constant 0 : index
    %c0_0 = arith.constant 0 : index
    %0 = vector.load %arg0[%c0, %c0_0] : memref<32x10xf32, #tpu.memory_space<vmem>>, vector<32x10xf32>
    %c0_1 = arith.constant 0 : index
    %c0_2 = arith.constant 0 : index
    %1 = vector.load %arg1[%c0_1, %c0_2] : memref<10x10xf32, #tpu.memory_space<vmem>>, vector<10x10xf32>
    %cst = arith.constant dense<0.000000e+00> : vector<32x10xf32>
    %2 = tpu.matmul %0, %1, %cst {dimension_numbers = #tpu.dot_dimension_numbers<[1], [0], [0], [1], [0, 0, 1, 1], [], []>} : vector<32x10xf32>, vector<10x10xf32>, vector<32x10xf32> -> vector<32x10xf32>
    %c0_3 = arith.constant 0 : index
    %c0_4 = arith.constant 0 : index
    %3 = vector.load %arg2[%c0_3, %c0_4] : memref<1x10xf32, #tpu.memory_space<vmem>>, vector<1x10xf32>
    %4 = vector.broadcast %3 : vector<1x10xf32> to vector<32x10xf32>
    %5 = arith.addf %2, %4 : vector<32x10xf32>
    %cst_5 = arith.constant 0.000000e+00 : f32
    %6 = vector.broadcast %cst_5 : f32 to vector<32x10xf32>
    %7 = arith.maximumf %5, %6 : vector<32x10xf32>
    %c0_6 = arith.constant 0 : index
    %c0_7 = arith.constant 0 : index
    %8 = vector.load %arg3[%c0_6, %c0_7] : memref<10x2xf32, #tpu.memory_space<vmem>>, vector<10x2xf32>
    %cst_8 = arith.constant dense<0.000000e+00> : vector<32x2xf32>
    %9 = tpu.matmul %7, %8, %cst_8 {dimension_numbers = #tpu.dot_dimension_numbers<[1], [0], [0], [1], [0, 0, 1, 1], [], []>} : vector<32x10xf32>, vector<10x2xf32>, vector<32x2xf32> -> vector<32x2xf32>
    %c0_9 = arith.constant 0 : index
    %c0_10 = arith.constant 0 : index
    %10 = vector.load %arg4[%c0_9, %c0_10] : memref<1x2xf32, #tpu.memory_space<vmem>>, vector<1x2xf32>
    %11 = vector.broadcast %10 : vector<1x2xf32> to vector<32x2xf32>
    %12 = arith.addf %9, %11 : vector<32x2xf32>
    %cst_11 = arith.constant dense<0xFF800000> : vector<32xf32>
    %13 = vector.multi_reduction <maximumf>, %12, %cst_11 [1] : vector<32x2xf32> to vector<32xf32>
    %14 = vector.shape_cast %13 : vector<32xf32> to vector<32x1xf32>
    %15 = vector.broadcast %14 : vector<32x1xf32> to vector<32x2xf32>
    %16 = arith.subf %12, %15 : vector<32x2xf32>
    %17 = math.exp %16 : vector<32x2xf32>
    %cst_12 = arith.constant dense<0.000000e+00> : vector<32xf32>
    %18 = vector.multi_reduction <add>, %17, %cst_12 [1] : vector<32x2xf32> to vector<32xf32>
    %19 = vector.shape_cast %18 : vector<32xf32> to vector<32x1xf32>
    %20 = math.log %19 : vector<32x1xf32>
    %21 = vector.broadcast %20 : vector<32x1xf32> to vector<32x2xf32>
    %22 = arith.subf %16, %21 : vector<32x2xf32>
    %c0_13 = arith.constant 0 : index
    %c0_14 = arith.constant 0 : index
    %23 = vector.load %arg5[%c0_13, %c0_14] : memref<32x2xf32, #tpu.memory_space<vmem>>, vector<32x2xf32>
    tpu.vector_store %arg5[%c0_13, %c0_14], %22 {strides = array<i32>} : memref<32x2xf32, #tpu.memory_space<vmem>>, vector<32x2xf32>,
    return
  }
}

</mosaic_0001>

<bundles_post_ra>
// kernel: net_forward.1
= control target key start
LH: loop header
LB: loop body
LE: loop exit
PB: predicated region body
PF: predicated region fallthrough
CT: control target
= control target key end

     0   :  { %vm46_vm0 = vcmask 1041408   ;;  %vm33_vm1 = vcmask 80896   ;;  %vm378_vm2 = vmmov 1   ;;  %vm248_vm4 = vcmask 15360   ;;  %s483_s1 = inlined_call_operand.vmem [shape: f32[10,10], index: 1, kind: input, shape index: {}]   ;;  %s484_s0 = inlined_call_operand.vmem [shape: f32[32,10], index: 0, kind: input, shape index: {}]   ;;  %s485_s3 = inlined_call_operand.vmem [shape: f32[10,2], index: 3, kind: input, shape index: {}]   ;;  %s486_s2 = inlined_call_operand.vmem [shape: f32[1,10], index: 2, kind: input, shape index: {}]   ;;  %s487_s4 = inlined_call_operand.vmem [shape: f32[1,2], index: 4, kind: input, shape index: {}]   ;;  %s488_s5 = inlined_call_operand.vmem [shape: f32[32,2], index: 5, kind: output, shape index: {}]  }
   0x1   :  { %v24_v0 = vld [vmem:[%s483_s1] sm:$0xff]  ;;  %v25_v1 = vld [vmem:[%s483_s1 + $0x8] sm:$0x3]  ;;  %vm415_vm3 = vmpackc.low %vm46_vm0, %vm378_vm2 }
   0x2   :  { %v349_v3 = vpack.c.bf16 %v25_v1, %v24_v0  ;;  %v20_v4 = vld [vmem:[%s484_s0] sm:$0xff]  ;;  %v21_v5 = vld [vmem:[%s484_s0 + $0x8] sm:$0xff]  ;;  %v22_v6 = vld [vmem:[%s484_s0 + $0x10] sm:$0xff] }
   0x3   :  { %333 = vmatprep.mubr.msk.f32.mxu0 %vm33_vm1, %v20_v4  ;;  %v23_v7 = vld [vmem:[%s484_s0 + $0x18] sm:$0xff]  ;;  %v139_v8 = vld [vmem:[%s485_s3] sm:$0xff]  ;;  %v140_v9 = vld [vmem:[%s485_s3 + $0x8] sm:$0x3] }
   0x4   :  { %351 = vmatprep.subr.msk.bf16.mxu0 %vm415_vm3, %v349_v3  ;;  %v355_v10 = vpack.c.bf16 %v140_v9, %v139_v8  ;;  %v305_v11 = vld [vmem:[%s486_s2] ss:$0 sm:$0xff] }
   0x5   :  { %354 = vmatpush3.bf16.msk.msra.mxu0 %vm415_vm3, %v349_v3  ;;  %v311_v24 = vld [vmem:[%s487_s4] ss:$0 sm:$0xff] }
   0x6   :  { %357 = vmatprep.subr.msk.bf16.mxu1 %vm415_vm3, %v355_v10 }
   0x7   :  { %360 = vmatpush3.bf16.msk.msra.mxu1 %vm415_vm3, %v355_v10 }
   0x8   :  { %334 = vmatmul.mubr.msk.f32.vlgmr.msra.gmra.mrb[0].mxu0 %vm33_vm1, %v21_v5 }
   0x9   :  { %336 = vmatprep.mubr.msk.f32.mxu0 %vm33_vm1, %v22_v6 }
   0xc   :  { %337 = vmatmul.mubr.msk.f32.gmra.mrb[2].mxu0 %vm33_vm1, %v23_v7 }
  0xdb   :  { %v335_v12 = vpop.f32.mrb[0].mxu0 }
  0xdc   :  { %v122_v13 = vadd.f32 %v335_v12, %v305_v11  ;;  %v116_v14 = vpop.f32.mrb[1].mxu0 }
  0xdd   :  { %v117_v15 = vadd.f32 %v305_v11, %v116_v14 }
  0xde   :  { %v136_v18 = vmax.f32 %v122_v13, 0.0 }
  0xdf   :  { %v135_v16 = vmax.f32 %v117_v15, 0.0  ;;  %v338_v17 = vpop.f32.mrb[2].mxu0 }
  0xe0   :  { %v132_v19 = vadd.f32 %v338_v17, %v305_v11  ;;  %v126_v20 = vpop.f32.mrb[3].mxu0 }
  0xe1   :  { %v127_v21 = vadd.f32 %v305_v11, %v126_v20  ;;  %343 = vmatprep.mubr.msk.f32.mxu1 %vm33_vm1, %v135_v16 }
  0xe2   :  { %344 = vmatmul.mubr.msk.f32.vlgmr.msra.gmra.mrb[0].mxu1 %vm33_vm1, %v136_v18  ;;  %v138_v23 = vmax.f32 %v132_v19, 0.0 }
  0xe3   :  { %v137_v22 = vmax.f32 %v127_v21, 0.0 }
  0xe5   :  { %346 = vmatprep.mubr.msk.f32.mxu1 %vm33_vm1, %v137_v22 }
  0xe6   :  { %347 = vmatmul.mubr.msk.f32.gmra.mrb[2].mxu1 %vm33_vm1, %v138_v23 }
 0x1b5   :  { %v345_v25 = vpop.f32.mrb[0].mxu1 }
 0x1b6   :  { %v229_v26 = vpop.f32.mrb[1].mxu1  ;;  %v235_v28 = vadd.f32 %v345_v25, %v311_v24 }
 0x1b7   :  { %v230_v27 = vadd.f32 %v311_v24, %v229_v26 }
 0x1b8   :  { %v252_v35 = vsel %vm248_vm4, %v235_v28, -inf }
 0x1b9   :  { %v348_v29 = vpop.f32.mrb[2].mxu1  ;;  %v249_v30 = vsel %vm248_vm4, %v230_v27, -inf }
 0x1ba   :  { %v239_v31 = vpop.f32.mrb[3].mxu1  ;;  %250 = vmax.xlane.f32.xlu0 %v249_v30  ;;  %v245_v33 = vadd.f32 %v348_v29, %v311_v24 }
 0x1bb   :  { %v240_v32 = vadd.f32 %v311_v24, %v239_v31 }
 0x1bc   :  { %v258_v36 = vsel %vm248_vm4, %v245_v33, -inf }
 0x1bd   :  { %v255_v34 = vsel %vm248_vm4, %v240_v32, -inf }
 0x1be   :  { %256 = vmax.xlane.f32.xlu1 %v255_v34  ;;  %253 = vmax.xlane.f32.xlu0 %v252_v35 }
 0x1c2   :  { %259 = vmax.xlane.f32.xlu1 %v258_v36 }
 0x247   :  { %v251_v37 = vpop.xlane.xlu0 %250 }
 0x248   :  { %v261_v38 = vsub.f32 %v230_v27, %v251_v37 }
 0x24a   :  { %v265_v39 = vmul.f32 1.442695, %v261_v38 }
 0x24b   :  { %v257_v40 = vpop.xlane.xlu1 %256  ;;  %v254_v41 = vpop.xlane.xlu0 %253 }
 0x24c   :  { %362 = vpow2.f32 %v265_v39  ;;  %v263_v42 = vsub.f32 %v240_v32, %v257_v40  ;;  %v262_v43 = vsub.f32 %v235_v28, %v254_v41 }
 0x24e   :  { %v269_v44 = vmul.f32 1.442695, %v263_v42  ;;  %v267_v45 = vmul.f32 1.442695, %v262_v43 }
 0x24f   :  { %v260_v46 = vpop.xlane.xlu1 %259 }
 0x250   :  { %364 = vpow2.f32 %v269_v44  ;;  %v264_v47 = vsub.f32 %v245_v33, %v260_v46 }
 0x251   :  { %366 = vpow2.f32 %v267_v45 }
 0x252   :  { %v271_v48 = vmul.f32 1.442695, %v264_v47 }
 0x254   :  { %368 = vpow2.f32 %v271_v48 }
 0x256   :  { %v363_v49 = vpop.eup %362 }
 0x257   :  { %v273_v50 = vsel %vm248_vm4, %v363_v49, 0.0 }
 0x258   :  { %274 = vadd.xlane.f32.xlu0 %v273_v50 }
 0x25a   :  { %v365_v51 = vpop.eup %364 }
 0x25b   :  { %v367_v52 = vpop.eup %366  ;;  %v279_v53 = vsel %vm248_vm4, %v365_v51, 0.0 }
 0x25c   :  { %280 = vadd.xlane.f32.xlu0 %v279_v53  ;;  %v276_v54 = vsel %vm248_vm4, %v367_v52, 0.0 }
 0x25d   :  { %277 = vadd.xlane.f32.xlu1 %v276_v54 }
 0x25e   :  { %v369_v55 = vpop.eup %368 }
 0x25f   :  { %v282_v56 = vsel %vm248_vm4, %v369_v55, 0.0 }
 0x261   :  { %283 = vadd.xlane.f32.xlu1 %v282_v56 }
 0x2e5   :  { %v275_v57 = vpop.xlane.xlu0 %274 }
 0x2e6   :  { %370 = vlog2.f32 %v275_v57 }
 0x2e9   :  { %v281_v58 = vpop.xlane.xlu0 %280 }
 0x2ea   :  { %v278_v59 = vpop.xlane.xlu1 %277  ;;  %372 = vlog2.f32 %v281_v58 }
 0x2eb   :  { %374 = vlog2.f32 %v278_v59 }
 0x2ee   :  { %v284_v60 = vpop.xlane.xlu1 %283 }
 0x2ef   :  { %376 = vlog2.f32 %v284_v60 }
 0x2f0   :  { %v371_v61 = vpop.eup %370 }
 0x2f1   :  { %v286_v62 = vmul.f32 0.6931472, %v371_v61 }
 0x2f3   :  { %v293_v63 = vsub.f32 %v261_v38, %v286_v62 }
 0x2f4   :  { %v373_v0 = vpop.eup %372 }
 0x2f5   :  { %v375_v1 = vpop.eup %374  ;;  %297 = vst.msk [vmem:[%s488_s5] sm:$0xff] %vm248_vm4, %v293_v63  ;;  %v290_v2 = vmul.f32 0.6931472, %v373_v0 }
 0x2f6   :  { %v288_v3 = vmul.f32 0.6931472, %v375_v1 }
 0x2f7   :  { %v295_v4 = vsub.f32 %v263_v42, %v290_v2 }
 0x2f8   :  { %v294_v5 = vsub.f32 %v262_v43, %v288_v3 }
 0x2f9   :  { %v377_v6 = vpop.eup %376  ;;  %299 = vst.msk [vmem:[%s488_s5 + $0x10] sm:$0xff] %vm248_vm4, %v295_v4 }
 0x2fa   :  { %298 = vst.msk [vmem:[%s488_s5 + $0x8] sm:$0xff] %vm248_vm4, %v294_v5  ;;  %v292_v7 = vmul.f32 0.6931472, %v377_v6 }
 0x2fc   :  { %v296_v8 = vsub.f32 %v264_v47, %v292_v7 }
 0x2fe   :  { %300 = vst.msk [vmem:[%s488_s5 + $0x18] sm:$0xff] %vm248_vm4, %v296_v8 }

</bundles_post_ra>
